<compile_context>
chip_gen: v7x
topology: tpu7x:2x2x1
jax: 0.10.0
libtpu: 0.0.40
codegen_flags: <defaults>
</compile_context>

<pallas_src>
import jax
import jax.numpy as jnp
from jax.experimental import pallas as pl
from jax.experimental.pallas import tpu as pltpu


# --------------------------------------------------------------------------- #
# Kernel
# --------------------------------------------------------------------------- #
def _make_kernel(L, Cout_p, has_downsample, mm_dtype):
    def kernel(x_ref, w1_ref, b1_ref, w2_ref, b2_ref, o_ref):
        x = x_ref[0]                                    # (Cin_p, P) f32
        P = x.shape[1]

        # Per-sample tap-validity masks: samples occupy lanes [j*L, (j+1)*L);
        # lane padding beyond the packed samples is zero input / dead output.
        lpos = jax.lax.broadcasted_iota(jnp.int32, (1, P), 1) % L
        has_left = lpos != 0
        has_right = lpos != (L - 1)

        def stack3(v):
            # [v(l-1); v(l); v(l+1)] stacked on the contraction (sublane) axis.
            left = jnp.where(has_left, pltpu.roll(v, 1, axis=1), 0.0)
            right = jnp.where(has_right, pltpu.roll(v, P - 1, axis=1), 0.0)
            return jnp.concatenate([left, v, right], axis=0).astype(mm_dtype)

        # conv1 (bn1 folded) + folded 1x1 downsample rows: ONE MXU matmul.
        r1 = jnp.dot(w1_ref[...], stack3(x),
                     preferred_element_type=jnp.float32) + b1_ref[...]
        h = jnp.maximum(r1[:Cout_p], 0.0)               # relu(bn1(conv1(x)))
        ident = r1[Cout_p:] if has_downsample else x    # bn_ds(conv_ds(x)) / x

        # conv2 (bn2 folded): ONE MXU matmul.
        out = jnp.dot(w2_ref[...], stack3(h),
                      preferred_element_type=jnp.float32) + b2_ref[...]
        o_ref[0] = jnp.maximum(out + ident, 0.0).astype(o_ref.dtype)

    return kernel


# --------------------------------------------------------------------------- #
# Wrapper
# --------------------------------------------------------------------------- #
def _round_up(a, m):
    return (a + m - 1) // m * m


def _fold_bn(gamma, beta, mean, var, eps=1e-5):
    scale = (gamma / jnp.sqrt(var + eps)).astype(jnp.float32)
    bias = (beta - mean * scale).astype(jnp.float32)
    return scale, bias


def _stacked_conv_weight(w, scale, cout_p, cin_p):
    """PyTorch (Cout, Cin, 3) conv weight * BN scale -> (Cout_p, 3*Cin_p)."""
    cout, cin, _ = w.shape
    w = w.astype(jnp.float32) * scale[:, None, None]
    w = jnp.pad(w, ((0, cout_p - cout), (0, cin_p - cin), (0, 0)))
    # Tap k=0 multiplies x[l-1], k=1 multiplies x[l], k=2 multiplies x[l+1].
    return jnp.concatenate([w[:, :, 0], w[:, :, 1], w[:, :, 2]], axis=1)


def residual_block_forward(x_ncl, params, stride=1, mm_dtype=jnp.bfloat16,
                           lane_target=512):
    # TODO(synk): stride > 1 not implemented (module default stride=1).
    assert stride == 1, "kernel implements stride=1 only"
    N, Cin, L = x_ncl.shape
    Cout = params["conv1_w"].shape[0]
    has_downsample = "ds_conv_w" in params
    if Cin != Cout:
        assert has_downsample, (
            "downsample params required when in_channels != out_channels")

    Cin_p, Cout_p = _round_up(Cin, 8), _round_up(Cout, 8)

    # Fold Nb samples onto the lane axis so each grid step sees a lane-dense
    # (C, P) tile; pad the lane axis up to a multiple of 128 (zero lanes can
    # never leak into real outputs thanks to the per-sample tap masks).
    Nb = 1 if L >= lane_target else max(1, min(N, lane_target // L))
    G = -(-N // Nb)
    Npad = G * Nb
    P = _round_up(Nb * L, 128)

    x = x_ncl.astype(jnp.float32)
    x = jnp.pad(x, ((0, Npad - N), (0, Cin_p - Cin), (0, 0)))
    x = x.reshape(G, Nb, Cin_p, L).transpose(0, 2, 1, 3).reshape(G, Cin_p, Nb * L)
    x = jnp.pad(x, ((0, 0), (0, 0), (0, P - Nb * L)))

    # Fold eval-mode BN into the conv weights; single stacked matrix per conv.
    s1, b1 = _fold_bn(*params["bn1"])
    s2, b2 = _fold_bn(*params["bn2"])
    w1 = _stacked_conv_weight(params["conv1_w"], s1, Cout_p, Cin_p)
    w2 = _stacked_conv_weight(params["conv2_w"], s2, Cout_p, Cout_p)
    b1 = jnp.pad(b1, (0, Cout_p - Cout)).reshape(Cout_p, 1)
    b2 = jnp.pad(b2, (0, Cout_p - Cout)).reshape(Cout_p, 1)

    if has_downsample:
        # Append the 1x1 downsample/BN as extra output rows of conv1's matmul
        # (weights live in the center-tap slot only).
        sds, bds = _fold_bn(*params["ds_bn"])
        wds = params["ds_conv_w"].astype(jnp.float32)[:, :, 0] * sds[:, None]
        wds = jnp.pad(wds, ((0, Cout_p - Cout), (0, Cin_p - Cin)))
        z = jnp.zeros((Cout_p, Cin_p), jnp.float32)
        w1 = jnp.concatenate([w1, jnp.concatenate([z, wds, z], axis=1)], axis=0)
        b1 = jnp.concatenate(
            [b1, jnp.pad(bds, (0, Cout_p - Cout)).reshape(Cout_p, 1)], axis=0)

    R1 = w1.shape[0]
    w1 = w1.astype(mm_dtype)          # MXU operand dtype (cast once, wrapper)
    w2 = w2.astype(mm_dtype)

    # Per-step VMEM: double-buffered (Cin_p + Cout_p) * P * 4B activation
    # tiles plus the small resident bf16 weights -- well under the scoped
    # VMEM defaults on v5e/v6e/v7x at these channel counts, so no
    # vmem_limit_bytes override is needed.
    out = pl.pallas_call(
        _make_kernel(L, Cout_p, has_downsample, mm_dtype),
        out_shape=jax.ShapeDtypeStruct((G, Cout_p, P), jnp.float32),
        grid=(G,),
        in_specs=[
            pl.BlockSpec((1, Cin_p, P), lambda g: (g, 0, 0)),   # sample group
            pl.BlockSpec((R1, 3 * Cin_p), lambda g: (0, 0)),    # resident weights
            pl.BlockSpec((R1, 1), lambda g: (0, 0)),
            pl.BlockSpec((Cout_p, 3 * Cout_p), lambda g: (0, 0)),
            pl.BlockSpec((Cout_p, 1), lambda g: (0, 0)),
        ],
        out_specs=pl.BlockSpec((1, Cout_p, P), lambda g: (g, 0, 0)),
        compiler_params=pltpu.CompilerParams(dimension_semantics=("parallel",)),
    )(x, w1, b1, w2, b2)

    # Undo the lane packing / padding (wrapper-side layout plumbing only).
    out = out[:, :, :Nb * L].reshape(G, Cout_p, Nb, L)
    out = out.transpose(0, 2, 1, 3).reshape(Npad, Cout_p, L)
    return out[:N, :Cout, :]


# --------------------------------------------------------------------------- #
# Pure-JAX reference (mirrors the PyTorch forward, eval-mode BN)
# --------------------------------------------------------------------------- #
def reference_forward(x, params, stride=1):
    def conv1d(x, w, stride, pad):
        return jax.lax.conv_general_dilated(
            x, w, window_strides=(stride,), padding=[(pad, pad)],
            dimension_numbers=("NCH", "OIH", "NCH"))

    def bn(x, p):
        g, b, m, v = p
        inv = 1.0 / jnp.sqrt(v + 1e-5)
        return (x - m[None, :, None]) * inv[None, :, None] * g[None, :, None] + b[None, :, None]

    out = jax.nn.relu(bn(conv1d(x, params["conv1_w"], stride, 1), params["bn1"]))
    out = bn(conv1d(out, params["conv2_w"], 1, 1), params["bn2"])
    ident = x
    if "ds_conv_w" in params:
        ident = bn(conv1d(x, params["ds_conv_w"], stride, 0), params["ds_bn"])
    return jax.nn.relu(out + ident)


def _make_params(key, Cin, Cout, with_downsample):
    ks = jax.random.split(key, 16)

    def bn_params(a, b, c, d):
        return (jax.random.uniform(ks[a], (Cout,), minval=0.5, maxval=1.5),   # gamma
                jax.random.normal(ks[b], (Cout,)) * 0.1,                      # beta
                jax.random.normal(ks[c], (Cout,)) * 0.1,                      # running_mean
                jax.random.uniform(ks[d], (Cout,), minval=0.5, maxval=1.5))   # running_var

    params = {
        "conv1_w": jax.random.normal(ks[0], (Cout, Cin, 3), jnp.float32) * 0.3,
        "conv2_w": jax.random.normal(ks[1], (Cout, Cout, 3), jnp.float32) * 0.3,
        "bn1": bn_params(2, 3, 4, 5),
        "bn2": bn_params(6, 7, 8, 9),
    }
    if with_downsample:
        params["ds_conv_w"] = jax.random.normal(ks[10], (Cout, Cin, 1), jnp.float32) * 0.3
        params["ds_bn"] = bn_params(11, 12, 13, 14)
    return params


if __name__ == "__main__":
    key = jax.random.PRNGKey(0)
    kA, kB, kx1, kx2 = jax.random.split(key, 4)
    N, L = 2, 16

    def check(out, ref):
        assert out.shape == ref.shape
        err = float(jnp.max(jnp.abs(out - ref)))
        # bf16 MXU operands (f32 accumulate): loosened vs the old 1e-4 check.
        tol = 3e-2 * float(jnp.max(jnp.abs(ref))) + 1e-2
        assert err <= tol, (err, tol)

    # Config A: in_channels != out_channels -> downsample folded into conv1.
    Cin, Cout = 4, 8
    xA = jax.random.normal(kx1, (N, Cin, L), jnp.float32)
    pA = _make_params(kA, Cin, Cout, with_downsample=True)
    outA = jax.block_until_ready(residual_block_forward(xA, pA, stride=1))
    check(outA, reference_forward(xA, pA, stride=1))

    # Config B: in_channels == out_channels -> pure identity residual
    # (exercises the static "no downsample rows" path).
    C = 8
    xB = jax.random.normal(kx2, (N, C, L), jnp.float32)
    pB = _make_params(kB, C, C, with_downsample=False)
    outB = jax.block_until_ready(residual_block_forward(xB, pB, stride=1))
    check(outB, reference_forward(xB, pB, stride=1))

    print("KERNEL_OK")
</pallas_src>

<mosaic_0001>
module attributes {stable_mosaic.version = 11 : i64} {
  func.func @kernel(%arg0: i32, %arg1: memref<1x8x128xf32, #tpu.memory_space<vmem>>, %arg2: memref<16x24xbf16, #tpu.memory_space<vmem>>, %arg3: memref<16x1xf32, #tpu.memory_space<vmem>>, %arg4: memref<8x24xbf16, #tpu.memory_space<vmem>>, %arg5: memref<8x1xf32, #tpu.memory_space<vmem>>, %arg6: memref<1x8x128xf32, #tpu.memory_space<vmem>>) attributes {dimension_semantics = [#tpu.dimension_semantics<parallel>], iteration_bounds = array<i64: 1>, scalar_prefetch = 0 : i64, scratch_operands = 0 : i64, tpu.core_type = #tpu.core_type<tc>, window_params = [{transform_indices = @transform_0, window_bounds = array<i64: 1, 8, 128>}, {pipeline_mode = #tpu.pipeline_mode<synchronous>, transform_indices = @transform_1, window_bounds = array<i64: 16, 24>}, {pipeline_mode = #tpu.pipeline_mode<synchronous>, transform_indices = @transform_2, window_bounds = array<i64: 16, 1>}, {pipeline_mode = #tpu.pipeline_mode<synchronous>, transform_indices = @transform_3, window_bounds = array<i64: 8, 24>}, {pipeline_mode = #tpu.pipeline_mode<synchronous>, transform_indices = @transform_4, window_bounds = array<i64: 8, 1>}, {transform_indices = @transform_5, window_bounds = array<i64: 1, 8, 128>}]} {
    %c0 = arith.constant 0 : index
    %c0_0 = arith.constant 0 : index
    %c0_1 = arith.constant 0 : index
    %0 = vector.load %arg1[%c0, %c0_0, %c0_1] : memref<1x8x128xf32, #tpu.memory_space<vmem>>, vector<1x8x128xf32>
    %1 = vector.shape_cast %0 : vector<1x8x128xf32> to vector<8x128xf32>
    %2 = tpu.iota {dimensions = array<i32: 1>} : vector<1x128xi32>
    %c16_i32 = arith.constant 16 : i32
    %c0_i32 = arith.constant 0 : i32
    %3 = arith.cmpi eq, %c16_i32, %c0_i32 : i32
    %c1_i32 = arith.constant 1 : i32
    %4 = arith.select %3, %c1_i32, %c16_i32 : i32
    %5 = vector.broadcast %4 : i32 to vector<1x128xi32>
    %6 = arith.remsi %2, %5 : vector<1x128xi32>
    %c0_i32_2 = arith.constant 0 : i32
    %7 = vector.broadcast %c0_i32_2 : i32 to vector<1x128xi32>
    %8 = arith.cmpi ne, %6, %7 : vector<1x128xi32>
    %c0_i32_3 = arith.constant 0 : i32
    %9 = vector.broadcast %c0_i32_3 : i32 to vector<1x128xi32>
    %10 = arith.cmpi slt, %6, %9 : vector<1x128xi32>
    %c0_i32_4 = arith.constant 0 : i32
    %11 = arith.cmpi slt, %4, %c0_i32_4 : i32
    %12 = vector.broadcast %11 : i1 to vector<1x128xi1>
    %13 = vector.broadcast %12 : vector<1x128xi1> to vector<1x128xi1>
    %14 = arith.xori %10, %13 : vector<1x128xi1>
    %15 = arith.andi %14, %8 : vector<1x128xi1>
    %16 = vector.broadcast %4 : i32 to vector<1x128xi32>
    %17 = arith.addi %6, %16 : vector<1x128xi32>
    %18 = arith.select %15, %17, %6 : vector<1x128xi1>, vector<1x128xi32>
    %c0_i32_5 = arith.constant 0 : i32
    %19 = vector.broadcast %c0_i32_5 : i32 to vector<1x128xi32>
    %20 = arith.cmpi ne, %18, %19 : vector<1x128xi32>
    %c15_i32 = arith.constant 15 : i32
    %21 = vector.broadcast %c15_i32 : i32 to vector<1x128xi32>
    %22 = arith.cmpi ne, %18, %21 : vector<1x128xi32>
    %c0_6 = arith.constant 0 : index
    %c0_7 = arith.constant 0 : index
    %23 = vector.load %arg2[%c0_6, %c0_7] : memref<16x24xbf16, #tpu.memory_space<vmem>>, vector<16x24xbf16>
    %c1_i32_8 = arith.constant 1 : i32
    %24 = tpu.dynamic_rotate %1 by %c1_i32_8 dim 1 : vector<8x128xf32>, i32 -> vector<8x128xf32>
    %cst = arith.constant 0.000000e+00 : f32
    %25 = vector.shape_cast %20 : vector<1x128xi1> to vector<1x128xi1>
    %26 = vector.broadcast %25 : vector<1x128xi1> to vector<8x128xi1>
    %27 = vector.broadcast %cst : f32 to vector<8x128xf32>
    %28 = arith.select %26, %24, %27 : vector<8x128xi1>, vector<8x128xf32>
    %c127_i32 = arith.constant 127 : i32
    %29 = tpu.dynamic_rotate %1 by %c127_i32 dim 1 : vector<8x128xf32>, i32 -> vector<8x128xf32>
    %cst_9 = arith.constant 0.000000e+00 : f32
    %30 = vector.shape_cast %22 : vector<1x128xi1> to vector<1x128xi1>
    %31 = vector.broadcast %30 : vector<1x128xi1> to vector<8x128xi1>
    %32 = vector.broadcast %cst_9 : f32 to vector<8x128xf32>
    %33 = arith.select %31, %29, %32 : vector<8x128xi1>, vector<8x128xf32>
    %34 = tpu.concatenate %28, %1, %33 in 0 : vector<8x128xf32>, vector<8x128xf32>, vector<8x128xf32> -> vector<24x128xf32>
    %35 = arith.truncf %34 : vector<24x128xf32> to vector<24x128xbf16>
    %cst_10 = arith.constant dense<0.000000e+00> : vector<16x128xf32>
    %36 = tpu.matmul %23, %35, %cst_10 {dimension_numbers = #tpu.dot_dimension_numbers<[1], [0], [0], [1], [0, 0, 1, 1], [], []>} : vector<16x24xbf16>, vector<24x128xbf16>, vector<16x128xf32> -> vector<16x128xf32>
    %c0_11 = arith.constant 0 : index
    %c0_12 = arith.constant 0 : index
    %37 = vector.load %arg3[%c0_11, %c0_12] : memref<16x1xf32, #tpu.memory_space<vmem>>, vector<16x1xf32>
    %38 = vector.broadcast %37 : vector<16x1xf32> to vector<16x128xf32>
    %39 = arith.addf %36, %38 : vector<16x128xf32>
    %40 = vector.extract_strided_slice %39 {offsets = [0, 0], sizes = [8, 128], strides = [1, 1]} : vector<16x128xf32> to vector<8x128xf32>
    %cst_13 = arith.constant 0.000000e+00 : f32
    %41 = vector.broadcast %cst_13 : f32 to vector<8x128xf32>
    %42 = arith.maximumf %40, %41 : vector<8x128xf32>
    %43 = vector.extract_strided_slice %39 {offsets = [8, 0], sizes = [8, 128], strides = [1, 1]} : vector<16x128xf32> to vector<8x128xf32>
    %c0_14 = arith.constant 0 : index
    %c0_15 = arith.constant 0 : index
    %44 = vector.load %arg4[%c0_14, %c0_15] : memref<8x24xbf16, #tpu.memory_space<vmem>>, vector<8x24xbf16>
    %c1_i32_16 = arith.constant 1 : i32
    %45 = tpu.dynamic_rotate %42 by %c1_i32_16 dim 1 : vector<8x128xf32>, i32 -> vector<8x128xf32>
    %cst_17 = arith.constant 0.000000e+00 : f32
    %46 = vector.shape_cast %20 : vector<1x128xi1> to vector<1x128xi1>
    %47 = vector.broadcast %46 : vector<1x128xi1> to vector<8x128xi1>
    %48 = vector.broadcast %cst_17 : f32 to vector<8x128xf32>
    %49 = arith.select %47, %45, %48 : vector<8x128xi1>, vector<8x128xf32>
    %c127_i32_18 = arith.constant 127 : i32
    %50 = tpu.dynamic_rotate %42 by %c127_i32_18 dim 1 : vector<8x128xf32>, i32 -> vector<8x128xf32>
    %cst_19 = arith.constant 0.000000e+00 : f32
    %51 = vector.shape_cast %22 : vector<1x128xi1> to vector<1x128xi1>
    %52 = vector.broadcast %51 : vector<1x128xi1> to vector<8x128xi1>
    %53 = vector.broadcast %cst_19 : f32 to vector<8x128xf32>
    %54 = arith.select %52, %50, %53 : vector<8x128xi1>, vector<8x128xf32>
    %55 = tpu.concatenate %49, %42, %54 in 0 : vector<8x128xf32>, vector<8x128xf32>, vector<8x128xf32> -> vector<24x128xf32>
    %56 = arith.truncf %55 : vector<24x128xf32> to vector<24x128xbf16>
    %cst_20 = arith.constant dense<0.000000e+00> : vector<8x128xf32>
    %57 = tpu.matmul %44, %56, %cst_20 {dimension_numbers = #tpu.dot_dimension_numbers<[1], [0], [0], [1], [0, 0, 1, 1], [], []>} : vector<8x24xbf16>, vector<24x128xbf16>, vector<8x128xf32> -> vector<8x128xf32>
    %c0_21 = arith.constant 0 : index
    %c0_22 = arith.constant 0 : index
    %58 = vector.load %arg5[%c0_21, %c0_22] : memref<8x1xf32, #tpu.memory_space<vmem>>, vector<8x1xf32>
    %59 = vector.broadcast %58 : vector<8x1xf32> to vector<8x128xf32>
    %60 = arith.addf %57, %59 : vector<8x128xf32>
    %61 = arith.addf %60, %43 : vector<8x128xf32>
    %cst_23 = arith.constant 0.000000e+00 : f32
    %62 = vector.broadcast %cst_23 : f32 to vector<8x128xf32>
    %63 = arith.maximumf %61, %62 : vector<8x128xf32>
    %c0_24 = arith.constant 0 : index
    %c0_25 = arith.constant 0 : index
    %c0_26 = arith.constant 0 : index
    %64 = vector.load %arg6[%c0_24, %c0_25, %c0_26] : memref<1x8x128xf32, #tpu.memory_space<vmem>>, vector<1x8x128xf32>
    %65 = vector.shape_cast %64 : vector<1x8x128xf32> to vector<8x128xf32>
    %66 = vector.shape_cast %63 : vector<8x128xf32> to vector<1x8x128xf32>
    tpu.vector_store %arg6[%c0_24, %c0_25, %c0_26], %66 {strides = array<i32>} : memref<1x8x128xf32, #tpu.memory_space<vmem>>, vector<1x8x128xf32>,
    return
  }
  func.func @transform_0(%arg0: i32) -> (i32, i32, i32) {
    %c0_i32 = arith.constant 0 : i32
    %c0_i32_0 = arith.constant 0 : i32
    %c0_i32_1 = arith.constant 0 : i32
    return %arg0, %c0_i32, %c0_i32_0 : i32, i32, i32
  }
  func.func @transform_1(%arg0: i32) -> (i32, i32) {
    %c0_i32 = arith.constant 0 : i32
    %c0_i32_0 = arith.constant 0 : i32
    %c0_i32_1 = arith.constant 0 : i32
    return %c0_i32, %c0_i32_0 : i32, i32
  }
  func.func @transform_2(%arg0: i32) -> (i32, i32) {
    %c0_i32 = arith.constant 0 : i32
    %c0_i32_0 = arith.constant 0 : i32
    %c0_i32_1 = arith.constant 0 : i32
    return %c0_i32, %c0_i32_0 : i32, i32
  }
  func.func @transform_3(%arg0: i32) -> (i32, i32) {
    %c0_i32 = arith.constant 0 : i32
    %c0_i32_0 = arith.constant 0 : i32
    %c0_i32_1 = arith.constant 0 : i32
    return %c0_i32, %c0_i32_0 : i32, i32
  }
  func.func @transform_4(%arg0: i32) -> (i32, i32) {
    %c0_i32 = arith.constant 0 : i32
    %c0_i32_0 = arith.constant 0 : i32
    %c0_i32_1 = arith.constant 0 : i32
    return %c0_i32, %c0_i32_0 : i32, i32
  }
  func.func @transform_5(%arg0: i32) -> (i32, i32, i32) {
    %c0_i32 = arith.constant 0 : i32
    %c0_i32_0 = arith.constant 0 : i32
    %c0_i32_1 = arith.constant 0 : i32
    return %arg0, %c0_i32, %c0_i32_0 : i32, i32, i32
  }
}

</mosaic_0001>

<bundles_post_ra>
// kernel: tpu_custom_call.1
= control target key start
LH: loop header
LB: loop body
LE: loop exit
PB: predicated region body
PF: predicated region fallthrough
CT: control target
= control target key end

     0   :  { %s263_s20 = smov 1   ;;  %v264_v1 = vmov 0.0   ;;  %vm265_vm0 = vmmov 0   ;;  %s352_s0 = inlined_call_operand.vmem [shape: f32[1,8,128], index: 0, kind: input, shape index: {}]   ;;  %s353_s1 = inlined_call_operand.vmem [shape: bf16[16,24], index: 1, kind: input, shape index: {}]   ;;  %s354_s2 = inlined_call_operand.vmem [shape: f32[16,1], index: 2, kind: input, shape index: {}]   ;;  %s355_s3 = inlined_call_operand.vmem [shape: bf16[8,24], index: 3, kind: input, shape index: {}]   ;;  %s356_s4 = inlined_call_operand.vmem [shape: f32[8,1], index: 4, kind: input, shape index: {}]   ;;  %s357_s5 = inlined_call_operand.hbm [shape: f32[1,8,128], index: 5, kind: output, shape index: {}]  }
   0x1   :  { %v22_v0 = vld [vmem:[%s352_s0] sm:$0xff]  ;;  %213 = vmatprep.subr.bf16.mxu0 %v264_v1  ;;  %217 = vmatprep.mubr.msk.bf16.mxu0 %vm265_vm0, %v264_v1 }
   0x2   :  { %41 = vrot.lane.b32.xlu0 %v22_v0, %s263_s20  ;;  %v53_v2 = vld [vmem:[%s354_s2] sm:$0xff]  ;;  %221 = vmatprep.subr.bf16.mxu1 %v264_v1 }
   0x3   :  { %10 = vsyncpa [#allocation3], 0  ;;  %v266_v3 = vmov 0   ;;  %225 = vmatprep.mubr.msk.bf16.mxu1 %vm265_vm0, %v264_v1  ;;  %s267_s23 = smov 127   ;;  %v23_v4 = vlaneseq  ;;  %vm268_vm2 = vmmov 1   ;;  %vm74_vm5 = vcmask 1043456  }
   0x4   :  { %236 = vset.pattern.permute.xlu1 %v266_v3  ;;  %237 = vset.pattern.permute.xlu0 %v266_v3  ;;  %v238_v15 = vld [vmem:[%s353_s1] sm:$0xff]   ;;  %vm70_vm6 = vcmask 195584   ;;  %v54_v23 = vld [vmem:[%s354_s2 + $0x8] sm:$0xff] }
   0x5   :  { %57 = vperm.xlu1 %236, %v53_v2   ;;  %v24_v5 = vand.u32 127, %v23_v4  ;;  %v129_v24 = vld [vmem:[%s356_s4] sm:$0xff]  ;;  %s269_s4 = smov [#allocation2]  }
   0x6   :  { %46 = vrot.lane.b32.xlu0 %v22_v0, %s267_s23  ;;  %v120_v31 = vld [vmem:[%s355_s3] sm:$0xf]  ;;  %s190_s29 = sshll.u32 %s269_s4, 4  ;;  %s191_s29 = int_to_ptr.vmem [resolvable:$true] %s190_s29 }
   0x7   :  { %v29_v6 = vand.u32 15, %v24_v5  ;;  %s239_s30 = scalar_lea.vmem %s191_s29, 128  ;;  %p244_p1 = scmp.lt.s32.totalorder %s191_s29, %s191_s29 }
   0x8   :  { %p240_p0 = scmp.ne.s32.totalorder %s191_s29, %s239_s30  ;;  %p245_p2 = scmp.lt.s32.totalorder %s239_s30, %s239_s30 }
   0x9   :  { %vm37_vm1 = vcmp.ne.s32.totalorder %v29_v6, 0  ;;  %vm311_vm4 = vcmp.ne.s32.totalorder %v29_v6, 15 }
   0xa   :  { %vm307_vm3 = vmpackc.low %vm268_vm2, %vm37_vm1  ;;  %p246_p3 = por %p245_p2, %p244_p1 }
   0xc   :  { %p247_p4 = pnand %p246_p3, %p240_p0 }
  0x74   :  { %v42_v7 = vpop.permute.xlu0 %41 }
  0x75   :  { %v200_v9 = vpack.c.bf16 %v22_v0, %v42_v7 }
  0x77   :  { %214 = vmatpush3.bf16.msk.msra.mxu0 %vm307_vm3, %v200_v9 }
  0x78   :  { %v47_v11 = vpop.permute.xlu0 %46  ;;  %215 = vmatprep.subr.bf16.mxu0 %v264_v1 }
  0x79   :  { %v50_v12 = vsel %vm311_vm4, %v47_v11, 0.0 }
  0x7a   :  { %v52_v13 = vpack.c.bf16 %v50_v12, %v50_v12 }
  0x7c   :  { %v76_v14 = vsel %vm74_vm5, %v52_v13, 0 }
  0x7d   :  { %216 = vmatpush3.bf16.msra.mxu0 %v76_v14 }
  0x80   :  { %218 = vmatmul.mubr.msk.bf16.vlgmr.msra.gmra.mrb[0].mxu0 %vm70_vm6, %v238_v15 }
  0x84   :  { %v58_v16 = vpop.permute.xlu1 %57 }
 0x153   :  { %v112_v17 = vpop.f32.mrb[0].mxu0 }
 0x154   :  { %v113_v18 = vadd.f32 %v112_v17, %v58_v16  ;;  %v219_v19 = vpop.f32.mrb[1].mxu0 }
 0x155   :  { %v115_v20 = vpop.f32.mrb[2].mxu0 }
 0x156   :  { %v119_v21 = vmax.f32 %v113_v18, 0.0  ;;  %v220_v22 = vpop.f32.mrb[3].mxu0 }
 0x158   :  { %124 = vrot.lane.b32.xlu0 %v119_v21, %s267_s23  ;;  %121 = vrot.lane.b32.xlu1 %v119_v21, %s263_s20 }
 0x15c   :  { %62 = vperm.xlu1 %236, %v54_v23   ;;  %132 = vperm.xlu0 %237, %v129_v24  }
 0x1ca   :  { %v125_v25 = vpop.permute.xlu0 %124  ;;  %v122_v26 = vpop.permute.xlu1 %121 }
 0x1cb   :  { %v126_v27 = vsel %vm311_vm4, %v125_v25, 0.0  ;;  %v204_v28 = vpack.c.bf16 %v119_v21, %v122_v26 }
 0x1cc   :  { %v128_v29 = vpack.c.bf16 %v126_v27, %v126_v27 }
 0x1cd   :  { %222 = vmatpush3.bf16.msk.msra.mxu1 %vm307_vm3, %v204_v28 }
 0x1ce   :  { %223 = vmatprep.subr.bf16.mxu1 %v264_v1  ;;  %v139_v30 = vsel %vm74_vm5, %v128_v29, 0 }
 0x1d1   :  { %224 = vmatpush3.bf16.msra.mxu1 %v139_v30 }
 0x1d4   :  { %226 = vmatmul.mubr.msk.bf16.vlgmr.msra.gmra.mrb[0].mxu1 %vm70_vm6, %v120_v31 }
 0x1db   :  { %v63_v32 = vpop.permute.xlu1 %62  ;;  %v133_v33 = vpop.permute.xlu0 %132 }
 0x1dc   :  { %v116_v35 = vadd.f32 %v115_v20, %v63_v32 }
 0x2a7   :  { %v175_v34 = vpop.f32.mrb[0].mxu1 }
 0x2a8   :  { %v176_v36 = vadd.f32 %v175_v34, %v133_v33  ;;  %v227_v37 = vpop.f32.mrb[1].mxu1 }
 0x2a9   :  { %v178_v38 = vpop.f32.mrb[2].mxu1 }
 0x2aa   :  { %v181_v39 = vadd.f32 %v176_v36, %v116_v35  ;;  %v228_v40 = vpop.f32.mrb[3].mxu1 }
 0x2ac   :  { %v182_v41 = vmax.f32 %v181_v39, 0.0 }
 0x2ae   :  { %183 = vst [vmem:[#allocation2] sm:$0xff] %v182_v41 }
 0x2af   :  { %250 = shalt.err (!%p247_p4)
}
 0x2b0   :  { %s251_s7 = scalar_lea.hbm %s357_s5, 128 }
 0x2b1   :  { %p252_p5 = scmp.ne.s32.totalorder %s357_s5, %s251_s7  ;;  %p255_p6 = scmp.lt.u32.totalorder %s251_s7, %s357_s5 }
 0x2b3   :  { %p257_p7 = pnand %p255_p6, %p252_p5 }
 0x2b5   :  { %260 = shalt.err (!%p257_p7)
}
 0x2b6   :  { %193 = dma.vmem_to_hbm [thread:$0]  %s191_s29, 128, %s357_s5, [#allocation3]  }
 0x2b7   :  { %261 = dma.done.wait [#allocation3], 128  }
 0x2b8   :  { %262 = vsyncadd [#allocation3], 4294967168 }
 0x2b9   :  { %197 = vsyncpa [#allocation3], 1 }

</bundles_post_ra>
